<compile_context>
chip_gen: v7x
topology: tpu7x:2x2x1
jax: 0.10.0
libtpu: 0.0.40
codegen_flags: <defaults>
</compile_context>

<pallas_src>
import jax
import jax.numpy as jnp
from jax.experimental import pallas as pl
from jax.experimental.pallas import tpu as pltpu

HID_SIZE = 64


def _round_up(n, m):
    return ((n + m - 1) // m) * m


def _critic_kernel(x_ref, w1_ref, b1_ref, w2_ref, b2_ref, w3_ref, b3_ref, o_ref):
    x = x_ref[...]

    # Layer 1: [tb, obs] @ [obs, HID] on the MXU (f32 accumulate) + bias, ReLU.
    h1 = jnp.dot(x.astype(w1_ref.dtype), w1_ref[...],
                 preferred_element_type=jnp.float32)
    h1 = jnp.maximum(h1 + b1_ref[...].astype(jnp.float32), 0.0)

    # Layer 2: [tb, HID] @ [HID, HID] + bias, ReLU.
    h2 = jnp.dot(h1.astype(w2_ref.dtype), w2_ref[...],
                 preferred_element_type=jnp.float32)
    h2 = jnp.maximum(h2 + b2_ref[...].astype(jnp.float32), 0.0)

    # Layer 3: [tb, HID] @ [HID, 1] -> [tb, 1].  Contraction dims are already
    # in natural MXU layout for both operands (no XLU transpose of h2).
    v = jnp.dot(h2.astype(w3_ref.dtype), w3_ref[...],
                preferred_element_type=jnp.float32)
    o_ref[...] = (v + b3_ref[...].astype(jnp.float32)).astype(o_ref.dtype)


def _pick_batch_tile(B, obs, x_itemsize, block_b):
    """Batch tile: multiple of 128, VMEM-budgeted (lane-padded), TC-aware."""
    lane = 128
    # Per-row VMEM bytes of the streamed operands, lane-padded:
    #   x block (tb, obs)  -> minor dim pads to >=128 lanes
    #   out block (tb, 1)  -> minor dim pads to 128 lanes, f32
    row_bytes = max(_round_up(obs, lane), lane) * x_itemsize + lane * 4
    budget = 16 << 20                      # double-buffered x+out stream budget
    tb_budget = max(lane, (budget // (2 * row_bytes)) // lane * lane)
    tb = min(_round_up(block_b, lane), tb_budget, _round_up(B, lane))
    if B > 4 * lane:
        # Keep >= ~4 grid steps on large batches so the "parallel" axis can
        # split across v7x's two TensorCores and the pipeline has work to hide.
        tb = min(tb, max(lane, _round_up(pl.cdiv(B, 4), lane)))
    return tb


def model_critic_forward(x, params, *, block_b=8192):
    """x: [B, obs] -> value: [B, 1] float32."""
    w1, b1, w2, b2, w3, b3 = params
    B, obs = x.shape
    hid = w1.shape[1]
    b1 = b1.reshape(1, hid)
    b2 = b2.reshape(1, hid)
    b3 = b3.reshape(1, 1)
    w3 = w3.reshape(hid, 1)

    tb = _pick_batch_tile(B, obs, x.dtype.itemsize, block_b)
    grid = (pl.cdiv(B, tb),)

    # VMEM accounting (lane-padded, double-buffered) -> per-kernel VMEM limit.
    lane = 128
    x_buf = tb * max(_round_up(obs, lane), lane) * x.dtype.itemsize
    o_buf = tb * lane * 4
    w_bytes = (_round_up(obs, 8) * _round_up(hid, lane) * w1.dtype.itemsize
               + _round_up(hid, 8) * _round_up(hid, lane) * w2.dtype.itemsize
               + _round_up(hid, 8) * lane * w3.dtype.itemsize
               + 3 * 8 * lane * 4)
    vmem_limit = int(min(2 * (x_buf + o_buf) + 2 * w_bytes + (8 << 20), 48 << 20))

    flops = 2 * B * (obs * hid + hid * hid + hid)
    bytes_accessed = (int(x.size) * x.dtype.itemsize
                      + sum(int(p.size) * p.dtype.itemsize
                            for p in (w1, b1, w2, b2, w3, b3))
                      + B * 4)

    const = lambda i: (0, 0)
    out = pl.pallas_call(
        _critic_kernel,
        out_shape=jax.ShapeDtypeStruct((B, 1), jnp.float32),
        grid=grid,
        in_specs=[
            pl.BlockSpec((tb, obs), lambda i: (i, 0)),   # x: streamed per tile
            pl.BlockSpec((obs, hid), const),             # w1 (VMEM-resident)
            pl.BlockSpec((1, hid), const),               # b1
            pl.BlockSpec((hid, hid), const),             # w2
            pl.BlockSpec((1, hid), const),               # b2
            pl.BlockSpec((hid, 1), const),               # w3
            pl.BlockSpec((1, 1), const),                 # b3
        ],
        out_specs=pl.BlockSpec((tb, 1), lambda i: (i, 0)),
        compiler_params=pltpu.CompilerParams(
            dimension_semantics=("parallel",),
            vmem_limit_bytes=vmem_limit),
        cost_estimate=pl.CostEstimate(
            flops=flops, transcendentals=0, bytes_accessed=bytes_accessed),
    )(x, w1, b1, w2, b2, w3, b3)
    return out


def init_params(key, obs_size):
    """Deterministic init mirroring PyTorch nn.Linear defaults
    (uniform(-1/sqrt(fan_in), 1/sqrt(fan_in))). Weights stored [in, out]."""
    def linear(key, fan_in, fan_out):
        kw, kb = jax.random.split(key)
        bound = 1.0 / jnp.sqrt(jnp.float32(fan_in))
        w = jax.random.uniform(kw, (fan_in, fan_out), jnp.float32, -bound, bound)
        b = jax.random.uniform(kb, (1, fan_out), jnp.float32, -bound, bound)
        return w, b

    k1, k2, k3 = jax.random.split(key, 3)
    w1, b1 = linear(k1, obs_size, HID_SIZE)
    w2, b2 = linear(k2, HID_SIZE, HID_SIZE)
    w3, b3 = linear(k3, HID_SIZE, 1)
    return (w1, b1, w2, b2, w3, b3)


def reference_forward(x, params):
    """Pure-JAX reference matching the kernel's precision behavior
    (cast activations to the weight dtype, accumulate in f32)."""
    w1, b1, w2, b2, w3, b3 = params
    f32 = jnp.float32
    h1 = jnp.maximum(
        jnp.dot(x.astype(w1.dtype), w1, preferred_element_type=f32)
        + b1.astype(f32), 0.0)
    h2 = jnp.maximum(
        jnp.dot(h1.astype(w2.dtype), w2, preferred_element_type=f32)
        + b2.astype(f32), 0.0)
    return (jnp.dot(h2.astype(w3.dtype), w3.reshape(-1, 1),
                    preferred_element_type=f32) + b3.astype(f32).reshape(1, 1))


if __name__ == "__main__":
    key = jax.random.PRNGKey(0)
    k_params, k_x = jax.random.split(key)

    batch, obs_size = 300, 32  # not a multiple of 128: exercises the ragged tail block
    params = init_params(k_params, obs_size)
    x = jax.random.normal(k_x, (batch, obs_size), jnp.float32)

    # --- f32 path (single grid step at this demo size) ---
    ref = reference_forward(x, params)
    out = model_critic_forward(x, params)
    jax.block_until_ready(out)
    assert out.shape == (batch, 1), out.shape
    assert jnp.allclose(out, ref, atol=1e-5, rtol=1e-5), "mismatch vs f32 reference"

    # --- small tile -> multi-step grid with a ragged final block ---
    out_tiled = model_critic_forward(x, params, block_b=128)
    jax.block_until_ready(out_tiled)
    assert jnp.allclose(out_tiled, ref, atol=1e-5, rtol=1e-5), "mismatch (tiled grid)"

    # --- bf16 streaming path (halves HBM traffic; f32 accumulation) ---
    params_bf = tuple(p.astype(jnp.bfloat16) for p in params)
    x_bf = x.astype(jnp.bfloat16)
    ref_bf = reference_forward(x_bf, params_bf)
    out_bf = model_critic_forward(x_bf, params_bf, block_b=128)
    jax.block_until_ready(out_bf)
    assert out_bf.dtype == jnp.float32
    assert jnp.allclose(out_bf, ref_bf, atol=2e-2, rtol=2e-2), "mismatch (bf16 path)"

    print("KERNEL_OK")
</pallas_src>

<mosaic_0001>
module attributes {stable_mosaic.version = 11 : i64} {
  func.func @_critic_kernel(%arg0: i32, %arg1: memref<384x32xf32, #tpu.memory_space<vmem>>, %arg2: memref<32x64xf32, #tpu.memory_space<vmem>>, %arg3: memref<1x64xf32, #tpu.memory_space<vmem>>, %arg4: memref<64x64xf32, #tpu.memory_space<vmem>>, %arg5: memref<1x64xf32, #tpu.memory_space<vmem>>, %arg6: memref<64x1xf32, #tpu.memory_space<vmem>>, %arg7: memref<1x1xf32, #tpu.memory_space<vmem>>, %arg8: memref<384x1xf32, #tpu.memory_space<vmem>>) attributes {dimension_semantics = [#tpu.dimension_semantics<parallel>], iteration_bounds = array<i64: 1>, scalar_prefetch = 0 : i64, scratch_operands = 0 : i64, tpu.core_type = #tpu.core_type<tc>, window_params = [{transform_indices = @transform_0, window_bounds = array<i64: 384, 32>}, {pipeline_mode = #tpu.pipeline_mode<synchronous>, transform_indices = @transform_1, window_bounds = array<i64: 32, 64>}, {pipeline_mode = #tpu.pipeline_mode<synchronous>, transform_indices = @transform_2, window_bounds = array<i64: 1, 64>}, {pipeline_mode = #tpu.pipeline_mode<synchronous>, transform_indices = @transform_3, window_bounds = array<i64: 64, 64>}, {pipeline_mode = #tpu.pipeline_mode<synchronous>, transform_indices = @transform_4, window_bounds = array<i64: 1, 64>}, {pipeline_mode = #tpu.pipeline_mode<synchronous>, transform_indices = @transform_5, window_bounds = array<i64: 64, 1>}, {pipeline_mode = #tpu.pipeline_mode<synchronous>, transform_indices = @transform_6, window_bounds = array<i64: 1, 1>}, {transform_indices = @transform_7, window_bounds = array<i64: 384, 1>}]} {
    %c0 = arith.constant 0 : index
    %c0_0 = arith.constant 0 : index
    %0 = vector.load %arg1[%c0, %c0_0] : memref<384x32xf32, #tpu.memory_space<vmem>>, vector<384x32xf32>
    %c0_1 = arith.constant 0 : index
    %c0_2 = arith.constant 0 : index
    %1 = vector.load %arg2[%c0_1, %c0_2] : memref<32x64xf32, #tpu.memory_space<vmem>>, vector<32x64xf32>
    %cst = arith.constant dense<0.000000e+00> : vector<384x64xf32>
    %2 = tpu.matmul %0, %1, %cst {dimension_numbers = #tpu.dot_dimension_numbers<[1], [0], [0], [1], [0, 0, 1, 1], [], []>} : vector<384x32xf32>, vector<32x64xf32>, vector<384x64xf32> -> vector<384x64xf32>
    %c0_3 = arith.constant 0 : index
    %c0_4 = arith.constant 0 : index
    %3 = vector.load %arg3[%c0_3, %c0_4] : memref<1x64xf32, #tpu.memory_space<vmem>>, vector<1x64xf32>
    %4 = vector.broadcast %3 : vector<1x64xf32> to vector<384x64xf32>
    %5 = arith.addf %2, %4 : vector<384x64xf32>
    %cst_5 = arith.constant 0.000000e+00 : f32
    %6 = vector.broadcast %cst_5 : f32 to vector<384x64xf32>
    %7 = arith.maximumf %5, %6 : vector<384x64xf32>
    %c0_6 = arith.constant 0 : index
    %c0_7 = arith.constant 0 : index
    %8 = vector.load %arg4[%c0_6, %c0_7] : memref<64x64xf32, #tpu.memory_space<vmem>>, vector<64x64xf32>
    %cst_8 = arith.constant dense<0.000000e+00> : vector<384x64xf32>
    %9 = tpu.matmul %7, %8, %cst_8 {dimension_numbers = #tpu.dot_dimension_numbers<[1], [0], [0], [1], [0, 0, 1, 1], [], []>} : vector<384x64xf32>, vector<64x64xf32>, vector<384x64xf32> -> vector<384x64xf32>
    %c0_9 = arith.constant 0 : index
    %c0_10 = arith.constant 0 : index
    %10 = vector.load %arg5[%c0_9, %c0_10] : memref<1x64xf32, #tpu.memory_space<vmem>>, vector<1x64xf32>
    %11 = vector.broadcast %10 : vector<1x64xf32> to vector<384x64xf32>
    %12 = arith.addf %9, %11 : vector<384x64xf32>
    %cst_11 = arith.constant 0.000000e+00 : f32
    %13 = vector.broadcast %cst_11 : f32 to vector<384x64xf32>
    %14 = arith.maximumf %12, %13 : vector<384x64xf32>
    %c0_12 = arith.constant 0 : index
    %c0_13 = arith.constant 0 : index
    %15 = vector.load %arg6[%c0_12, %c0_13] : memref<64x1xf32, #tpu.memory_space<vmem>>, vector<64x1xf32>
    %cst_14 = arith.constant dense<0.000000e+00> : vector<384x1xf32>
    %16 = tpu.matmul %14, %15, %cst_14 {dimension_numbers = #tpu.dot_dimension_numbers<[1], [0], [0], [1], [0, 0, 1, 1], [], []>} : vector<384x64xf32>, vector<64x1xf32>, vector<384x1xf32> -> vector<384x1xf32>
    %c0_15 = arith.constant 0 : index
    %c0_16 = arith.constant 0 : index
    %17 = vector.load %arg7[%c0_15, %c0_16] : memref<1x1xf32, #tpu.memory_space<vmem>>, vector<1x1xf32>
    %18 = vector.broadcast %17 : vector<1x1xf32> to vector<384x1xf32>
    %19 = arith.addf %16, %18 : vector<384x1xf32>
    %c0_17 = arith.constant 0 : index
    %c0_18 = arith.constant 0 : index
    %20 = vector.load %arg8[%c0_17, %c0_18] : memref<384x1xf32, #tpu.memory_space<vmem>>, vector<384x1xf32>
    tpu.vector_store %arg8[%c0_17, %c0_18], %19 {strides = array<i32>} : memref<384x1xf32, #tpu.memory_space<vmem>>, vector<384x1xf32>,
    return
  }
  func.func @transform_0(%arg0: i32) -> (i32, i32) {
    %c0_i32 = arith.constant 0 : i32
    %c0_i32_0 = arith.constant 0 : i32
    return %arg0, %c0_i32 : i32, i32
  }
  func.func @transform_1(%arg0: i32) -> (i32, i32) {
    %c0_i32 = arith.constant 0 : i32
    %c0_i32_0 = arith.constant 0 : i32
    %c0_i32_1 = arith.constant 0 : i32
    return %c0_i32, %c0_i32_0 : i32, i32
  }
  func.func @transform_2(%arg0: i32) -> (i32, i32) {
    %c0_i32 = arith.constant 0 : i32
    %c0_i32_0 = arith.constant 0 : i32
    %c0_i32_1 = arith.constant 0 : i32
    return %c0_i32, %c0_i32_0 : i32, i32
  }
  func.func @transform_3(%arg0: i32) -> (i32, i32) {
    %c0_i32 = arith.constant 0 : i32
    %c0_i32_0 = arith.constant 0 : i32
    %c0_i32_1 = arith.constant 0 : i32
    return %c0_i32, %c0_i32_0 : i32, i32
  }
  func.func @transform_4(%arg0: i32) -> (i32, i32) {
    %c0_i32 = arith.constant 0 : i32
    %c0_i32_0 = arith.constant 0 : i32
    %c0_i32_1 = arith.constant 0 : i32
    return %c0_i32, %c0_i32_0 : i32, i32
  }
  func.func @transform_5(%arg0: i32) -> (i32, i32) {
    %c0_i32 = arith.constant 0 : i32
    %c0_i32_0 = arith.constant 0 : i32
    %c0_i32_1 = arith.constant 0 : i32
    return %c0_i32, %c0_i32_0 : i32, i32
  }
  func.func @transform_6(%arg0: i32) -> (i32, i32) {
    %c0_i32 = arith.constant 0 : i32
    %c0_i32_0 = arith.constant 0 : i32
    %c0_i32_1 = arith.constant 0 : i32
    return %c0_i32, %c0_i32_0 : i32, i32
  }
  func.func @transform_7(%arg0: i32) -> (i32, i32) {
    %c0_i32 = arith.constant 0 : i32
    %c0_i32_0 = arith.constant 0 : i32
    return %arg0, %c0_i32 : i32, i32
  }
}

</mosaic_0001>

<bundles_post_ra>
// kernel: tpu_custom_call.1
= control target key start
LH: loop header
LB: loop body
LE: loop exit
PB: predicated region body
PF: predicated region fallthrough
CT: control target
= control target key end

     0   :  { %s3168_s0 = inlined_call_operand.vmem [shape: f32[300,32], index: 0, kind: input, shape index: {}]   ;;  %s3169_s1 = inlined_call_operand.vmem [shape: f32[32,64], index: 1, kind: input, shape index: {}]   ;;  %s3170_s2 = inlined_call_operand.vmem [shape: f32[1,64], index: 2, kind: input, shape index: {}]   ;;  %s3171_s3 = inlined_call_operand.vmem [shape: f32[64,64], index: 3, kind: input, shape index: {}]   ;;  %s3172_s4 = inlined_call_operand.vmem [shape: f32[1,64], index: 4, kind: input, shape index: {}]   ;;  %s3173_s5 = inlined_call_operand.vmem [shape: f32[64,1], index: 5, kind: input, shape index: {}]   ;;  %s3174_s6 = inlined_call_operand.<no memory space> [shape: f32[1,1], index: 6, kind: input, shape index: {}]   ;;  %s3175_s7 = inlined_call_operand.vmem [shape: f32[300,1], index: 7, kind: output, shape index: {}]  }
   0x1   :  { %v12_v0 = vstv %s3174_s6 }
   0x2   :  { %13 = vst [vmem:[#allocation2] sm:$0x1] %v12_v0 }
   0x3   :  { %v76_v1 = vld [vmem:[%s3169_s1] sm:$0xff]  ;;  %v77_v2 = vld [vmem:[%s3169_s1 + $0x8] sm:$0xff]  ;;  %v78_v3 = vld [vmem:[%s3169_s1 + $0x10] sm:$0xff]  ;;  %vm87_vm0 = vcmask 261120   ;;  %vm600_vm1 = vcmask 523264   ;;  %vm1562_vm2 = vcmask 7168  }
   0x4   :  { %v2366_v4 = vpack.c.bf16 %v77_v2, %v76_v1  ;;  %v79_v5 = vld [vmem:[%s3169_s1 + $0x18] sm:$0xff]  ;;  %v28_v6 = vld [vmem:[%s3168_s0] sm:$0xff]  ;;  %v29_v8 = vld [vmem:[%s3168_s0 + $0x8] sm:$0xff] }
   0x5   :  { %v2370_v7 = vpack.c.bf16 %v79_v5, %v78_v3  ;;  %2118 = vmatprep.mubr.msk.f32.mxu0 %vm87_vm0, %v28_v6  ;;  %v30_v9 = vld [vmem:[%s3168_s0 + $0x10] sm:$0xff]  ;;  %v52_v10 = vld [vmem:[%s3168_s0 + $0xc0] sm:$0xff]  ;;  %v53_v11 = vld [vmem:[%s3168_s0 + $0xc8] sm:$0xff] }
   0x6   :  { %2367 = vmatprep.subr.bf16.mxu0 %v2366_v4  ;;  %2406 = vmatprep.subr.bf16.mxu1 %v2366_v4  ;;  %v54_v12 = vld [vmem:[%s3168_s0 + $0xd0] sm:$0xff]  ;;  %v31_v13 = vld [vmem:[%s3168_s0 + $0x18] sm:$0xff]  ;;  %v32_v15 = vld [vmem:[%s3168_s0 + $0x20] sm:$0xff] }
   0x7   :  { %2369 = vmatpush3.bf16.msra.mxu0 %v2366_v4  ;;  %2408 = vmatpush3.bf16.msra.mxu1 %v2366_v4  ;;  %v55_v14 = vld [vmem:[%s3168_s0 + $0xd8] sm:$0xff]  ;;  %v56_v16 = vld [vmem:[%s3168_s0 + $0xe0] sm:$0xff]  ;;  %v33_v17 = vld [vmem:[%s3168_s0 + $0x28] sm:$0xff] }
   0x8   :  { %2371 = vmatprep.subr.bf16.mxu0 %v2370_v7  ;;  %2407 = vmatprep.subr.bf16.mxu1 %v2370_v7  ;;  %v34_v18 = vld [vmem:[%s3168_s0 + $0x30] sm:$0xff]  ;;  %v57_v19 = vld [vmem:[%s3168_s0 + $0xe8] sm:$0xff]  ;;  %v585_v21 = vld [vmem:[%s3171_s3] sm:$0xff] }
   0x9   :  { %2154 = vmatprep.mubr.msk.f32.mxu1 %vm87_vm0, %v52_v10  ;;  %v58_v20 = vld [vmem:[%s3168_s0 + $0xf0] sm:$0xff]  ;;  %v586_v22 = vld [vmem:[%s3171_s3 + $0x8] sm:$0xff]  ;;  %v588_v25 = vld [vmem:[%s3171_s3 + $0x18] sm:$0xff] }
   0xa   :  { %v2374_v23 = vpack.c.bf16 %v586_v22, %v585_v21  ;;  %v587_v24 = vld [vmem:[%s3171_s3 + $0x10] sm:$0xff]  ;;  %v35_v26 = vld [vmem:[%s3168_s0 + $0x38] sm:$0xff]  ;;  %v36_v28 = vld [vmem:[%s3168_s0 + $0x40] sm:$0xff] }
   0xb   :  { %2373 = vmatpush3.bf16.msra.mxu0 %v2370_v7  ;;  %2409 = vmatpush3.bf16.msra.mxu1 %v2370_v7  ;;  %v59_v27 = vld [vmem:[%s3168_s0 + $0xf8] sm:$0xff]  ;;  %v60_v29 = vld [vmem:[%s3168_s0 + $0x100] sm:$0xff]  ;;  %v2378_v30 = vpack.c.bf16 %v588_v25, %v587_v24  ;;  %v590_v32 = vld [vmem:[%s3171_s3 + $0x28] sm:$0xff] }
   0xc   :  { %2375 = vmatprep.subr.bf16.mxu1 %v2374_v23  ;;  %v589_v31 = vld [vmem:[%s3171_s3 + $0x20] sm:$0xff]  ;;  %v37_v33 = vld [vmem:[%s3168_s0 + $0x48] sm:$0xff]  ;;  %v38_v35 = vld [vmem:[%s3168_s0 + $0x50] sm:$0xff] }
   0xd   :  { %v61_v34 = vld [vmem:[%s3168_s0 + $0x108] sm:$0xff]  ;;  %v62_v36 = vld [vmem:[%s3168_s0 + $0x110] sm:$0xff]  ;;  %v2382_v37 = vpack.c.bf16 %v590_v32, %v589_v31  ;;  %v592_v39 = vld [vmem:[%s3171_s3 + $0x38] sm:$0xff] }
   0xe   :  { %2119 = vmatmul.mubr.msk.f32.vlgmr.msra.gmra.mrb[0].mxu0 %vm87_vm0, %v29_v8  ;;  %2155 = vmatmul.mubr.msk.f32.vlgmr.msra.gmra.mrb[0].mxu1 %vm87_vm0, %v53_v11  ;;  %v591_v38 = vld [vmem:[%s3171_s3 + $0x30] sm:$0xff]  ;;  %v39_v40 = vld [vmem:[%s3168_s0 + $0x58] sm:$0xff]  ;;  %v40_v42 = vld [vmem:[%s3168_s0 + $0x60] sm:$0xff] }
   0xf   :  { %2121 = vmatprep.mubr.msk.f32.mxu0 %vm87_vm0, %v30_v9  ;;  %2157 = vmatprep.mubr.msk.f32.mxu1 %vm87_vm0, %v54_v12  ;;  %v63_v41 = vld [vmem:[%s3168_s0 + $0x118] sm:$0xff]  ;;  %v64_v43 = vld [vmem:[%s3168_s0 + $0x120] sm:$0xff]  ;;  %v2386_v44 = vpack.c.bf16 %v592_v39, %v591_v38  ;;  %v41_v45 = vld [vmem:[%s3168_s0 + $0x68] sm:$0xff] }
  0x10   :  { %2377 = vmatpush3.bf16.msra.mxu1 %v2374_v23  ;;  %v65_v46 = vld [vmem:[%s3168_s0 + $0x128] sm:$0xff]  ;;  %v42_v47 = vld [vmem:[%s3168_s0 + $0x70] sm:$0xff]  ;;  %v43_v49 = vld [vmem:[%s3168_s0 + $0x78] sm:$0xff] }
  0x11   :  { %2379 = vmatprep.subr.bf16.mxu1 %v2378_v30  ;;  %v66_v48 = vld [vmem:[%s3168_s0 + $0x130] sm:$0xff]  ;;  %v67_v50 = vld [vmem:[%s3168_s0 + $0x138] sm:$0xff]  ;;  %v44_v51 = vld [vmem:[%s3168_s0 + $0x80] sm:$0xff] }
  0x12   :  { %2122 = vmatmul.mubr.msk.f32.gmra.mrb[2].mxu0 %vm87_vm0, %v31_v13  ;;  %2158 = vmatmul.mubr.msk.f32.gmra.mrb[2].mxu1 %vm87_vm0, %v55_v14  ;;  %v68_v52 = vld [vmem:[%s3168_s0 + $0x140] sm:$0xff]  ;;  %v45_v53 = vld [vmem:[%s3168_s0 + $0x88] sm:$0xff]  ;;  %v46_v55 = vld [vmem:[%s3168_s0 + $0x90] sm:$0xff] }
  0x13   :  { %2124 = vmatprep.mubr.msk.f32.mxu0 %vm87_vm0, %v32_v15  ;;  %2160 = vmatprep.mubr.msk.f32.mxu1 %vm87_vm0, %v56_v16  ;;  %v69_v54 = vld [vmem:[%s3168_s0 + $0x148] sm:$0xff]  ;;  %v70_v56 = vld [vmem:[%s3168_s0 + $0x150] sm:$0xff]  ;;  %v47_v57 = vld [vmem:[%s3168_s0 + $0x98] sm:$0xff] }
  0x14   :  { %2381 = vmatpush3.bf16.msra.mxu1 %v2378_v30  ;;  %v71_v58 = vld [vmem:[%s3168_s0 + $0x158] sm:$0xff]  ;;  %v48_v59 = vld [vmem:[%s3168_s0 + $0xa0] sm:$0xff]  ;;  %v49_v61 = vld [vmem:[%s3168_s0 + $0xa8] sm:$0xff] }
  0x15   :  { %2383 = vmatprep.subr.bf16.mxu1 %v2382_v37  ;;  %v72_v60 = vld [vmem:[%s3168_s0 + $0x160] sm:$0xff]  ;;  %v73_v62 = vld [vmem:[%s3168_s0 + $0x168] sm:$0xff]  ;;  %v50_v63 = vld [vmem:[%s3168_s0 + $0xb0] sm:$0xff] }
  0x16   :  { %2125 = vmatmul.mubr.msk.f32.gmra.mrb[4].mxu0 %vm87_vm0, %v33_v17  ;;  %2161 = vmatmul.mubr.msk.f32.gmra.mrb[4].mxu1 %vm87_vm0, %v57_v19  ;;  %v74_v0 = vld [vmem:[%s3168_s0 + $0x170] sm:$0xff]  ;;  %v51_v1 = vld [vmem:[%s3168_s0 + $0xb8] sm:$0xff]  ;;  %v1098_v3 = vld [vmem:[%s3173_s5] sm:$0xff] }
  0x17   :  { %2127 = vmatprep.mubr.msk.f32.mxu0 %vm87_vm0, %v34_v18  ;;  %2163 = vmatprep.mubr.msk.f32.mxu1 %vm87_vm0, %v58_v20  ;;  %v75_v2 = vld [vmem:[%s3168_s0 + $0x178] sm:$0xff]  ;;  %v1099_v4 = vld [vmem:[%s3173_s5 + $0x8] sm:$0xff]  ;;  %v1100_v5 = vld [vmem:[%s3173_s5 + $0x10] sm:$0xff] }
  0x18   :  { %2385 = vmatpush3.bf16.msra.mxu1 %v2382_v37  ;;  %v2390_v6 = vpack.c.bf16 %v1099_v4, %v1098_v3  ;;  %v1101_v7 = vld [vmem:[%s3173_s5 + $0x18] sm:$0xff]  ;;  %v1102_v9 = vld [vmem:[%s3173_s5 + $0x20] sm:$0xff]  ;;  %v1103_v10 = vld [vmem:[%s3173_s5 + $0x28] sm:$0xff] }
  0x19   :  { %2387 = vmatprep.subr.bf16.mxu1 %v2386_v44  ;;  %v2394_v8 = vpack.c.bf16 %v1101_v7, %v1100_v5  ;;  %v2398_v11 = vpack.c.bf16 %v1103_v10, %v1102_v9  ;;  %v1104_v12 = vld [vmem:[%s3173_s5 + $0x30] sm:$0xff]  ;;  %v1105_v13 = vld [vmem:[%s3173_s5 + $0x38] sm:$0xff]  ;;  %v2708_v15 = vld [vmem:[%s3170_s2] ss:$0 sm:$0xff] }
  0x1a   :  { %2128 = vmatmul.mubr.msk.f32.gmra.mrb[6].mxu0 %vm87_vm0, %v35_v26  ;;  %2164 = vmatmul.mubr.msk.f32.gmra.mrb[6].mxu1 %vm87_vm0, %v59_v27  ;;  %v2402_v14 = vpack.c.bf16 %v1105_v13, %v1104_v12 }
  0x1b   :  { %2130 = vmatprep.mubr.msk.f32.mxu0 %vm87_vm0, %v36_v28  ;;  %2166 = vmatprep.mubr.msk.f32.mxu1 %vm87_vm0, %v60_v29 }
  0x1c   :  { %2389 = vmatpush3.bf16.msra.mxu1 %v2386_v44  ;;  %2391 = vmatprep.subr.bf16.mxu0 %v2390_v6 }
  0x1d   :  { %2393 = vmatpush3.bf16.msra.mxu0 %v2390_v6 }
  0x1e   :  { %2131 = vmatmul.mubr.msk.f32.gmra.mrb[8].mxu0 %vm87_vm0, %v37_v33  ;;  %2167 = vmatmul.mubr.msk.f32.gmra.mrb[8].mxu1 %vm87_vm0, %v61_v34 }
  0x1f   :  { %2133 = vmatprep.mubr.msk.f32.mxu0 %vm87_vm0, %v38_v35  ;;  %2169 = vmatprep.mubr.msk.f32.mxu1 %vm87_vm0, %v62_v36 }
  0x20   :  { %2395 = vmatprep.subr.bf16.mxu0 %v2394_v8 }
  0x21   :  { %2397 = vmatpush3.bf16.msra.mxu0 %v2394_v8 }
  0x22   :  { %2134 = vmatmul.mubr.msk.f32.gmra.mrb[10].mxu0 %vm87_vm0, %v39_v40  ;;  %2170 = vmatmul.mubr.msk.f32.gmra.mrb[10].mxu1 %vm87_vm0, %v63_v41 }
  0x23   :  { %2136 = vmatprep.mubr.msk.f32.mxu0 %vm87_vm0, %v40_v42  ;;  %2172 = vmatprep.mubr.msk.f32.mxu1 %vm87_vm0, %v64_v43 }
  0x24   :  { %2399 = vmatprep.subr.bf16.mxu0 %v2398_v11 }
  0x25   :  { %2401 = vmatpush3.bf16.msra.mxu0 %v2398_v11 }
  0x26   :  { %2137 = vmatmul.mubr.msk.f32.gmra.mrb[12].mxu0 %vm87_vm0, %v41_v45  ;;  %2173 = vmatmul.mubr.msk.f32.gmra.mrb[12].mxu1 %vm87_vm0, %v65_v46 }
  0x27   :  { %2139 = vmatprep.mubr.msk.f32.mxu0 %vm87_vm0, %v42_v47  ;;  %2175 = vmatprep.mubr.msk.f32.mxu1 %vm87_vm0, %v66_v48 }
  0x28   :  { %2403 = vmatprep.subr.bf16.mxu0 %v2402_v14 }
  0x29   :  { %2405 = vmatpush3.bf16.msra.mxu0 %v2402_v14 }
  0x2a   :  { %2140 = vmatmul.mubr.msk.f32.gmra.mrb[14].mxu0 %vm87_vm0, %v43_v49  ;;  %2176 = vmatmul.mubr.msk.f32.gmra.mrb[14].mxu1 %vm87_vm0, %v67_v50 }
  0x2b   :  { %2142 = vmatprep.mubr.msk.f32.mxu0 %vm87_vm0, %v44_v51  ;;  %2178 = vmatprep.mubr.msk.f32.mxu1 %vm87_vm0, %v68_v52 }
  0x2e   :  { %2143 = vmatmul.mubr.msk.f32.gmra.mrb[16].mxu0 %vm87_vm0, %v45_v53  ;;  %2179 = vmatmul.mubr.msk.f32.gmra.mrb[16].mxu1 %vm87_vm0, %v69_v54 }
  0x2f   :  { %2145 = vmatprep.mubr.msk.f32.mxu0 %vm87_vm0, %v46_v55  ;;  %2181 = vmatprep.mubr.msk.f32.mxu1 %vm87_vm0, %v70_v56 }
  0x32   :  { %2146 = vmatmul.mubr.msk.f32.gmra.mrb[18].mxu0 %vm87_vm0, %v47_v57  ;;  %2182 = vmatmul.mubr.msk.f32.gmra.mrb[18].mxu1 %vm87_vm0, %v71_v58 }
  0x33   :  { %2148 = vmatprep.mubr.msk.f32.mxu0 %vm87_vm0, %v48_v59  ;;  %2184 = vmatprep.mubr.msk.f32.mxu1 %vm87_vm0, %v72_v60 }
  0x36   :  { %2149 = vmatmul.mubr.msk.f32.gmra.mrb[20].mxu0 %vm87_vm0, %v49_v61  ;;  %2185 = vmatmul.mubr.msk.f32.gmra.mrb[20].mxu1 %vm87_vm0, %v73_v62 }
  0x37   :  { %2151 = vmatprep.mubr.msk.f32.mxu0 %vm87_vm0, %v50_v63  ;;  %2187 = vmatprep.mubr.msk.f32.mxu1 %vm87_vm0, %v74_v0 }
  0x3a   :  { %2152 = vmatmul.mubr.msk.f32.gmra.mrb[22].mxu0 %vm87_vm0, %v51_v1  ;;  %2188 = vmatmul.mubr.msk.f32.gmra.mrb[22].mxu1 %vm87_vm0, %v75_v2 }
  0xe1   :  { %v2120_v16 = vpop.f32.mrb[0].mxu0  ;;  %v2710_v17 = vpop.f32.mrb[0].mxu1 }
  0xe2   :  { %v304_v18 = vadd.f32 %v2120_v16, %v2708_v15  ;;  %v298_v19 = vpop.f32.mrb[1].mxu0  ;;  %v2713_v20 = vpop.f32.mrb[1].mxu1 }
  0xe3   :  { %v299_v21 = vadd.f32 %v2708_v15, %v298_v19 }
  0xe4   :  { %v538_v25 = vmax.f32 %v304_v18, 0.0 }
  0xe5   :  { %v537_v22 = vmax.f32 %v299_v21, 0.0  ;;  %v2123_v23 = vpop.f32.mrb[2].mxu0  ;;  %v2716_v24 = vpop.f32.mrb[2].mxu1 }
  0xe6   :  { %v314_v26 = vadd.f32 %v2123_v23, %v2708_v15  ;;  %v308_v27 = vpop.f32.mrb[3].mxu0  ;;  %v2719_v28 = vpop.f32.mrb[3].mxu1 }
  0xe7   :  { %v309_v29 = vadd.f32 %v2708_v15, %v308_v27  ;;  %2206 = vmatprep.mubr.msk.f32.mxu1 %vm600_vm1, %v537_v22 }
  0xe8   :  { %2207 = vmatmul.mubr.msk.f32.vlgmr.msra.gmra.mrb[24].mxu1 %vm600_vm1, %v538_v25  ;;  %v540_v33 = vmax.f32 %v314_v26, 0.0 }
  0xe9   :  { %v539_v30 = vmax.f32 %v309_v29, 0.0  ;;  %v2126_v31 = vpop.f32.mrb[4].mxu0  ;;  %v2724_v32 = vpop.f32.mrb[4].mxu1 }
  0xea   :  { %v324_v34 = vadd.f32 %v2126_v31, %v2708_v15  ;;  %v318_v35 = vpop.f32.mrb[5].mxu0  ;;  %v2727_v36 = vpop.f32.mrb[5].mxu1 }
  0xeb   :  { %v319_v37 = vadd.f32 %v2708_v15, %v318_v35  ;;  %2209 = vmatprep.mubr.msk.f32.mxu1 %vm600_vm1, %v539_v30 }
  0xec   :  { %2210 = vmatmul.mubr.msk.f32.gmra.mrb[26].mxu1 %vm600_vm1, %v540_v33  ;;  %v542_v41 = vmax.f32 %v324_v34, 0.0 }
  0xed   :  { %v541_v38 = vmax.f32 %v319_v37, 0.0  ;;  %v2129_v39 = vpop.f32.mrb[6].mxu0  ;;  %v2732_v40 = vpop.f32.mrb[6].mxu1 }
  0xee   :  { %v334_v42 = vadd.f32 %v2129_v39, %v2708_v15  ;;  %v328_v43 = vpop.f32.mrb[7].mxu0  ;;  %v2735_v44 = vpop.f32.mrb[7].mxu1 }
  0xef   :  { %v329_v45 = vadd.f32 %v2708_v15, %v328_v43  ;;  %2212 = vmatprep.mubr.msk.f32.mxu1 %vm600_vm1, %v541_v38 }
  0xf0   :  { %2213 = vmatmul.mubr.msk.f32.gmra.mrb[28].mxu1 %vm600_vm1, %v542_v41  ;;  %v544_v49 = vmax.f32 %v334_v42, 0.0 }
  0xf1   :  { %v543_v46 = vmax.f32 %v329_v45, 0.0  ;;  %v2132_v47 = vpop.f32.mrb[8].mxu0  ;;  %v2168_v48 = vpop.f32.mrb[8].mxu1 }
  0xf2   :  { %v344_v50 = vadd.f32 %v2132_v47, %v2708_v15  ;;  %v338_v51 = vpop.f32.mrb[9].mxu0  ;;  %v2742_v52 = vadd.f32 %v2168_v48, %v2708_v15  ;;  %v2744_v53 = vpop.f32.mrb[9].mxu1 }
  0xf3   :  { %v339_v54 = vadd.f32 %v2708_v15, %v338_v51  ;;  %2215 = vmatprep.mubr.msk.f32.mxu1 %vm600_vm1, %v543_v46 }
  0xf4   :  { %2216 = vmatmul.mubr.msk.f32.gmra.mrb[30].mxu1 %vm600_vm1, %v544_v49  ;;  %v546_v58 = vmax.f32 %v344_v50, 0.0 }
  0xf5   :  { %v545_v55 = vmax.f32 %v339_v54, 0.0  ;;  %v2135_v56 = vpop.f32.mrb[10].mxu0  ;;  %v2171_v57 = vpop.f32.mrb[10].mxu1 }
  0xf6   :  { %v354_v59 = vadd.f32 %v2135_v56, %v2708_v15  ;;  %v348_v60 = vpop.f32.mrb[11].mxu0  ;;  %v2751_v61 = vadd.f32 %v2171_v57, %v2708_v15  ;;  %v468_v62 = vpop.f32.mrb[11].mxu1 }
  0xf7   :  { %v349_v63 = vadd.f32 %v2708_v15, %v348_v60  ;;  %2218 = vmatprep.mubr.msk.f32.mxu1 %vm600_vm1, %v545_v55  ;;  %v2756_v0 = vadd.f32 %v2708_v15, %v468_v62 }
  0xf8   :  { %2219 = vmatmul.mubr.msk.f32.gmra.mrb[32].mxu1 %vm600_vm1, %v546_v58  ;;  %v548_v4 = vmax.f32 %v354_v59, 0.0 }
  0xf9   :  { %v547_v1 = vmax.f32 %v349_v63, 0.0  ;;  %v2138_v2 = vpop.f32.mrb[12].mxu0  ;;  %v2174_v3 = vpop.f32.mrb[12].mxu1 }
  0xfa   :  { %v364_v5 = vadd.f32 %v2138_v2, %v2708_v15  ;;  %v358_v6 = vpop.f32.mrb[13].mxu0  ;;  %v2761_v7 = vadd.f32 %v2174_v3, %v2708_v15  ;;  %v478_v8 = vpop.f32.mrb[13].mxu1  ;;  %v419_v2 = vadd.f32 %v2708_v15, %v2713_v20  ;;  %v429_v20 = vadd.f32 %v2708_v15, %v2719_v28 }
  0xfb   :  { %v359_v9 = vadd.f32 %v2708_v15, %v358_v6  ;;  %2221 = vmatprep.mubr.msk.f32.mxu1 %vm600_vm1, %v547_v1  ;;  %v2766_v10 = vadd.f32 %v2708_v15, %v478_v8 }
  0xfc   :  { %2222 = vmatmul.mubr.msk.f32.gmra.mrb[34].mxu1 %vm600_vm1, %v548_v4  ;;  %v550_v14 = vmax.f32 %v364_v5, 0.0 }
  0xfd   :  { %v549_v11 = vmax.f32 %v359_v9, 0.0  ;;  %v2141_v12 = vpop.f32.mrb[14].mxu0  ;;  %v2177_v13 = vpop.f32.mrb[14].mxu1 }
  0xfe   :  { %v374_v16 = vadd.f32 %v2141_v12, %v2708_v15  ;;  %v368_v18 = vpop.f32.mrb[15].mxu0  ;;  %v2771_v19 = vadd.f32 %v2177_v13, %v2708_v15  ;;  %v488_v21 = vpop.f32.mrb[15].mxu1 }
  0xff   :  { %v369_v22 = vadd.f32 %v2708_v15, %v368_v18  ;;  %2224 = vmatprep.mubr.msk.f32.mxu1 %vm600_vm1, %v549_v11  ;;  %v2776_v23 = vadd.f32 %v2708_v15, %v488_v21  ;;  %v424_v18 = vadd.f32 %v2710_v17, %v2708_v15  ;;  %v563_v21 = vmax.f32 %v429_v20, 0.0 }
 0x100   :  { %2225 = vmatmul.mubr.msk.f32.gmra.mrb[36].mxu1 %vm600_vm1, %v550_v14  ;;  %v552_v29 = vmax.f32 %v374_v16, 0.0  ;;  %v561_v14 = vmax.f32 %v419_v2, 0.0  ;;  %v449_v17 = vadd.f32 %v2708_v15, %v2735_v44 }
 0x101   :  { %v551_v25 = vmax.f32 %v369_v22, 0.0  ;;  %v2144_v26 = vpop.f32.mrb[16].mxu0  ;;  %v2180_v27 = vpop.f32.mrb[16].mxu1  ;;  %v439_v22 = vadd.f32 %v2708_v15, %v2727_v36 }
 0x102   :  { %v384_v30 = vadd.f32 %v2144_v26, %v2708_v15  ;;  %v378_v31 = vpop.f32.mrb[17].mxu0  ;;  %v2781_v33 = vadd.f32 %v2180_v27, %v2708_v15  ;;  %v498_v34 = vpop.f32.mrb[17].mxu1  ;;  %v434_v26 = vadd.f32 %v2716_v24, %v2708_v15  ;;  %v459_v24 = vadd.f32 %v2708_v15, %v2744_v53 }
 0x103   :  { %v379_v35 = vadd.f32 %v2708_v15, %v378_v31  ;;  %2227 = vmatprep.mubr.msk.f32.mxu1 %vm600_vm1, %v551_v25  ;;  %v2786_v37 = vadd.f32 %v2708_v15, %v498_v34  ;;  %v562_v25 = vmax.f32 %v424_v18, 0.0  ;;  %v565_v28 = vmax.f32 %v439_v22, 0.0 }
 0x104   :  { %2228 = vmatmul.mubr.msk.f32.gmra.mrb[38].mxu1 %vm600_vm1, %v552_v29  ;;  %v554_v42 = vmax.f32 %v384_v30, 0.0  ;;  %v564_v27 = vmax.f32 %v434_v26, 0.0  ;;  %v444_v29 = vadd.f32 %v2724_v32, %v2708_v15  ;;  %v567_v30 = vmax.f32 %v449_v17, 0.0 }
 0x105   :  { %v553_v38 = vmax.f32 %v379_v35, 0.0  ;;  %v2147_v39 = vpop.f32.mrb[18].mxu0  ;;  %v2183_v41 = vpop.f32.mrb[18].mxu1  ;;  %v454_v31 = vadd.f32 %v2732_v40, %v2708_v15  ;;  %v569_v34 = vmax.f32 %v459_v24, 0.0  ;;  %v571_v32 = vmax.f32 %v2756_v0, 0.0 }
 0x106   :  { %v394_v43 = vadd.f32 %v2147_v39, %v2708_v15  ;;  %v388_v45 = vpop.f32.mrb[19].mxu0  ;;  %v2791_v46 = vadd.f32 %v2183_v41, %v2708_v15  ;;  %v508_v47 = vpop.f32.mrb[19].mxu1  ;;  %v566_v36 = vmax.f32 %v444_v29, 0.0  ;;  %v570_v35 = vmax.f32 %v2742_v52, 0.0  ;;  %v2878_v39 = vld [vmem:[%s3172_s4] ss:$0 sm:$0xff] }
 0x107   :  { %v389_v48 = vadd.f32 %v2708_v15, %v388_v45  ;;  %2230 = vmatprep.mubr.msk.f32.mxu1 %vm600_vm1, %v553_v38  ;;  %v2796_v49 = vadd.f32 %v2708_v15, %v508_v47  ;;  %v568_v44 = vmax.f32 %v454_v31, 0.0  ;;  %v573_v53 = vmax.f32 %v2766_v10, 0.0 }
 0x108   :  { %2231 = vmatmul.mubr.msk.f32.gmra.mrb[40].mxu1 %vm600_vm1, %v554_v42  ;;  %v556_v55 = vmax.f32 %v394_v43, 0.0  ;;  %v575_v40 = vmax.f32 %v2776_v23, 0.0  ;;  %v574_v0 = vmax.f32 %v2761_v7, 0.0  ;;  %v577_v52 = vmax.f32 %v2786_v37, 0.0 }
 0x109   :  { %v555_v50 = vmax.f32 %v389_v48, 0.0  ;;  %v2150_v51 = vpop.f32.mrb[20].mxu0  ;;  %v2186_v54 = vpop.f32.mrb[20].mxu1  ;;  %v576_v10 = vmax.f32 %v2771_v19, 0.0  ;;  %v578_v23 = vmax.f32 %v2781_v33, 0.0  ;;  %v580_v37 = vmax.f32 %v2791_v46, 0.0 }
 0x10a   :  { %v404_v56 = vadd.f32 %v2150_v51, %v2708_v15  ;;  %v398_v57 = vpop.f32.mrb[21].mxu0  ;;  %v2801_v58 = vadd.f32 %v2186_v54, %v2708_v15  ;;  %v518_v59 = vpop.f32.mrb[21].mxu1 }
 0x10b   :  { %v399_v60 = vadd.f32 %v2708_v15, %v398_v57  ;;  %2233 = vmatprep.mubr.msk.f32.mxu1 %vm600_vm1, %v555_v50  ;;  %v2806_v62 = vadd.f32 %v2708_v15, %v518_v59 }
 0x10c   :  { %2234 = vmatmul.mubr.msk.f32.gmra.mrb[42].mxu1 %vm600_vm1, %v556_v55  ;;  %v558_v4 = vmax.f32 %v404_v56, 0.0  ;;  %v582_v19 = vmax.f32 %v2801_v58, 0.0 }
 0x10d   :  { %v557_v63 = vmax.f32 %v399_v60, 0.0  ;;  %v2153_v1 = vpop.f32.mrb[22].mxu0  ;;  %v2189_v3 = vpop.f32.mrb[22].mxu1  ;;  %v581_v7 = vmax.f32 %v2806_v62, 0.0 }
 0x10e   :  { %v414_v5 = vadd.f32 %v2153_v1, %v2708_v15  ;;  %v408_v6 = vpop.f32.mrb[23].mxu0  ;;  %v2813_v8 = vadd.f32 %v2189_v3, %v2708_v15  ;;  %v528_v9 = vpop.f32.mrb[23].mxu1 }
 0x10f   :  { %v409_v11 = vadd.f32 %v2708_v15, %v408_v6  ;;  %2236 = vmatprep.mubr.msk.f32.mxu1 %vm600_vm1, %v557_v63  ;;  %v529_v12 = vadd.f32 %v2708_v15, %v528_v9  ;;  %v572_v15 = vmax.f32 %v2751_v61, 0.0  ;;  %v579_v61 = vmax.f32 %v2796_v49, 0.0 }
 0x110   :  { %2237 = vmatmul.mubr.msk.f32.gmra.mrb[44].mxu1 %vm600_vm1, %v558_v4  ;;  %v560_v16 = vmax.f32 %v414_v5, 0.0  ;;  %v584_v33 = vmax.f32 %v2813_v8, 0.0 }
 0x111   :  { %v559_v13 = vmax.f32 %v409_v11, 0.0  ;;  %v583_v38 = vmax.f32 %v529_v12, 0.0 }
 0x113   :  { %2239 = vmatprep.mubr.msk.f32.mxu1 %vm600_vm1, %v559_v13 }
 0x114   :  { %2240 = vmatmul.mubr.msk.f32.gmra.mrb[46].mxu1 %vm600_vm1, %v560_v16 }
 0x115   :  { %2242 = vmatprep.mubr.msk.f32.mxu1 %vm600_vm1, %v561_v14 }
 0x118   :  { %2243 = vmatmul.mubr.msk.f32.gmra.mrb[48].mxu1 %vm600_vm1, %v562_v25 }
 0x119   :  { %2245 = vmatprep.mubr.msk.f32.mxu1 %vm600_vm1, %v563_v21 }
 0x11c   :  { %2246 = vmatmul.mubr.msk.f32.gmra.mrb[50].mxu1 %vm600_vm1, %v564_v27 }
 0x11d   :  { %2248 = vmatprep.mubr.msk.f32.mxu1 %vm600_vm1, %v565_v28 }
 0x120   :  { %2249 = vmatmul.mubr.msk.f32.gmra.mrb[52].mxu1 %vm600_vm1, %v566_v36 }
 0x121   :  { %2251 = vmatprep.mubr.msk.f32.mxu1 %vm600_vm1, %v567_v30 }
 0x124   :  { %2252 = vmatmul.mubr.msk.f32.gmra.mrb[54].mxu1 %vm600_vm1, %v568_v44 }
 0x125   :  { %2254 = vmatprep.mubr.msk.f32.mxu1 %vm600_vm1, %v569_v34 }
 0x128   :  { %2255 = vmatmul.mubr.msk.f32.gmra.mrb[56].mxu1 %vm600_vm1, %v570_v35 }
 0x129   :  { %2257 = vmatprep.mubr.msk.f32.mxu1 %vm600_vm1, %v571_v32 }
 0x12c   :  { %2258 = vmatmul.mubr.msk.f32.gmra.mrb[58].mxu1 %vm600_vm1, %v572_v15 }
 0x12d   :  { %2260 = vmatprep.mubr.msk.f32.mxu1 %vm600_vm1, %v573_v53 }
 0x130   :  { %2261 = vmatmul.mubr.msk.f32.gmra.mrb[60].mxu1 %vm600_vm1, %v574_v0 }
 0x131   :  { %2263 = vmatprep.mubr.msk.f32.mxu1 %vm600_vm1, %v575_v40 }
 0x134   :  { %2264 = vmatmul.mubr.msk.f32.gmra.mrb[62].mxu1 %vm600_vm1, %v576_v10 }
 0x135   :  { %2266 = vmatprep.mubr.msk.f32.mxu1 %vm600_vm1, %v577_v52 }
 0x138   :  { %2267 = vmatmul.mubr.msk.f32.gmra.mrb[64].mxu1 %vm600_vm1, %v578_v23 }
 0x139   :  { %2269 = vmatprep.mubr.msk.f32.mxu1 %vm600_vm1, %v579_v61 }
 0x13c   :  { %2270 = vmatmul.mubr.msk.f32.gmra.mrb[66].mxu1 %vm600_vm1, %v580_v37 }
 0x13d   :  { %2272 = vmatprep.mubr.msk.f32.mxu1 %vm600_vm1, %v581_v7 }
 0x140   :  { %2273 = vmatmul.mubr.msk.f32.gmra.mrb[68].mxu1 %vm600_vm1, %v582_v19 }
 0x141   :  { %2275 = vmatprep.mubr.msk.f32.mxu1 %vm600_vm1, %v583_v38 }
 0x144   :  { %2276 = vmatmul.mubr.msk.f32.gmra.mrb[70].mxu1 %vm600_vm1, %v584_v33 }
 0x1bb   :  { %v2208_v41 = vpop.f32.mrb[24].mxu1 }
 0x1bc   :  { %v817_v42 = vadd.f32 %v2208_v41, %v2878_v39  ;;  %v811_v43 = vpop.f32.mrb[25].mxu1 }
 0x1bd   :  { %v812_v45 = vadd.f32 %v2878_v39, %v811_v43 }
 0x1be   :  { %v1051_v48 = vmax.f32 %v817_v42, 0.0 }
 0x1bf   :  { %v1050_v46 = vmax.f32 %v812_v45, 0.0  ;;  %v2211_v47 = vpop.f32.mrb[26].mxu1 }
 0x1c0   :  { %v827_v49 = vadd.f32 %v2211_v47, %v2878_v39  ;;  %v821_v50 = vpop.f32.mrb[27].mxu1 }
 0x1c1   :  { %v822_v51 = vadd.f32 %v2878_v39, %v821_v50  ;;  %2294 = vmatprep.mubr.msk.f32.mxu0 %vm600_vm1, %v1050_v46 }
 0x1c2   :  { %2295 = vmatmul.mubr.msk.f32.vlgmr.msra.gmra.mrb[24].mxu0 %vm600_vm1, %v1051_v48  ;;  %v1053_v56 = vmax.f32 %v827_v49, 0.0 }
 0x1c3   :  { %v1052_v54 = vmax.f32 %v822_v51, 0.0  ;;  %v2214_v55 = vpop.f32.mrb[28].mxu1 }
 0x1c4   :  { %v837_v57 = vadd.f32 %v2214_v55, %v2878_v39  ;;  %v831_v58 = vpop.f32.mrb[29].mxu1 }
 0x1c5   :  { %v832_v59 = vadd.f32 %v2878_v39, %v831_v58  ;;  %2297 = vmatprep.mubr.msk.f32.mxu0 %vm600_vm1, %v1052_v54 }
 0x1c6   :  { %2298 = vmatmul.mubr.msk.f32.gmra.mrb[26].mxu0 %vm600_vm1, %v1053_v56  ;;  %v1055_v63 = vmax.f32 %v837_v57, 0.0 }
 0x1c7   :  { %v1054_v60 = vmax.f32 %v832_v59, 0.0  ;;  %v2217_v62 = vpop.f32.mrb[30].mxu1 }
 0x1c8   :  { %v847_v1 = vadd.f32 %v2217_v62, %v2878_v39  ;;  %v841_v2 = vpop.f32.mrb[31].mxu1 }
 0x1c9   :  { %v842_v3 = vadd.f32 %v2878_v39, %v841_v2  ;;  %2300 = vmatprep.mubr.msk.f32.mxu0 %vm600_vm1, %v1054_v60 }
 0x1ca   :  { %2301 = vmatmul.mubr.msk.f32.gmra.mrb[28].mxu0 %vm600_vm1, %v1055_v63  ;;  %v1057_v6 = vmax.f32 %v847_v1, 0.0 }
 0x1cb   :  { %v1056_v4 = vmax.f32 %v842_v3, 0.0  ;;  %v2220_v5 = vpop.f32.mrb[32].mxu1 }
 0x1cc   :  { %v857_v8 = vadd.f32 %v2220_v5, %v2878_v39  ;;  %v851_v9 = vpop.f32.mrb[33].mxu1 }
 0x1cd   :  { %v852_v11 = vadd.f32 %v2878_v39, %v851_v9  ;;  %2303 = vmatprep.mubr.msk.f32.mxu0 %vm600_vm1, %v1056_v4 }
 0x1ce   :  { %2304 = vmatmul.mubr.msk.f32.gmra.mrb[30].mxu0 %vm600_vm1, %v1057_v6  ;;  %v1059_v14 = vmax.f32 %v857_v8, 0.0 }
 0x1cf   :  { %v1058_v12 = vmax.f32 %v852_v11, 0.0  ;;  %v2223_v13 = vpop.f32.mrb[34].mxu1 }
 0x1d0   :  { %v867_v20 = vadd.f32 %v2223_v13, %v2878_v39  ;;  %v861_v16 = vpop.f32.mrb[35].mxu1 }
 0x1d1   :  { %v862_v18 = vadd.f32 %v2878_v39, %v861_v16  ;;  %2306 = vmatprep.mubr.msk.f32.mxu0 %vm600_vm1, %v1058_v12 }
 0x1d2   :  { %2307 = vmatmul.mubr.msk.f32.gmra.mrb[32].mxu0 %vm600_vm1, %v1059_v14  ;;  %v1061_v25 = vmax.f32 %v867_v20, 0.0 }
 0x1d3   :  { %v1060_v21 = vmax.f32 %v862_v18, 0.0  ;;  %v2226_v22 = vpop.f32.mrb[36].mxu1 }
 0x1d4   :  { %v877_v26 = vadd.f32 %v2226_v22, %v2878_v39  ;;  %v871_v28 = vpop.f32.mrb[37].mxu1 }
 0x1d5   :  { %v872_v17 = vadd.f32 %v2878_v39, %v871_v28  ;;  %2309 = vmatprep.mubr.msk.f32.mxu0 %vm600_vm1, %v1060_v21 }
 0x1d6   :  { %2310 = vmatmul.mubr.msk.f32.gmra.mrb[34].mxu0 %vm600_vm1, %v1061_v25  ;;  %v1063_v30 = vmax.f32 %v877_v26, 0.0 }
 0x1d7   :  { %v1062_v27 = vmax.f32 %v872_v17, 0.0  ;;  %v2229_v29 = vpop.f32.mrb[38].mxu1 }
 0x1d8   :  { %v887_v24 = vadd.f32 %v2229_v29, %v2878_v39  ;;  %v881_v36 = vpop.f32.mrb[39].mxu1 }
 0x1d9   :  { %v882_v31 = vadd.f32 %v2878_v39, %v881_v36  ;;  %2312 = vmatprep.mubr.msk.f32.mxu0 %vm600_vm1, %v1062_v27 }
 0x1da   :  { %2313 = vmatmul.mubr.msk.f32.gmra.mrb[36].mxu0 %vm600_vm1, %v1063_v30  ;;  %v1065_v32 = vmax.f32 %v887_v24, 0.0 }
 0x1db   :  { %v1064_v34 = vmax.f32 %v882_v31, 0.0  ;;  %v2232_v44 = vpop.f32.mrb[40].mxu1 }
 0x1dc   :  { %v897_v35 = vadd.f32 %v2232_v44, %v2878_v39  ;;  %v891_v53 = vpop.f32.mrb[41].mxu1 }
 0x1dd   :  { %v892_v15 = vadd.f32 %v2878_v39, %v891_v53  ;;  %2315 = vmatprep.mubr.msk.f32.mxu0 %vm600_vm1, %v1064_v34 }
 0x1de   :  { %2316 = vmatmul.mubr.msk.f32.gmra.mrb[38].mxu0 %vm600_vm1, %v1065_v32  ;;  %v1067_v52 = vmax.f32 %v897_v35, 0.0 }
 0x1df   :  { %v1066_v40 = vmax.f32 %v892_v15, 0.0  ;;  %v2235_v0 = vpop.f32.mrb[42].mxu1 }
 0x1e0   :  { %v907_v10 = vadd.f32 %v2235_v0, %v2878_v39  ;;  %v901_v61 = vpop.f32.mrb[43].mxu1 }
 0x1e1   :  { %v902_v23 = vadd.f32 %v2878_v39, %v901_v61  ;;  %2318 = vmatprep.mubr.msk.f32.mxu0 %vm600_vm1, %v1066_v40 }
 0x1e2   :  { %2319 = vmatmul.mubr.msk.f32.gmra.mrb[40].mxu0 %vm600_vm1, %v1067_v52  ;;  %v1069_v38 = vmax.f32 %v907_v10, 0.0 }
 0x1e3   :  { %v1068_v7 = vmax.f32 %v902_v23, 0.0  ;;  %v2238_v37 = vpop.f32.mrb[44].mxu1 }
 0x1e4   :  { %v917_v19 = vadd.f32 %v2238_v37, %v2878_v39  ;;  %v911_v33 = vpop.f32.mrb[45].mxu1 }
 0x1e5   :  { %v912_v41 = vadd.f32 %v2878_v39, %v911_v33  ;;  %2321 = vmatprep.mubr.msk.f32.mxu0 %vm600_vm1, %v1068_v7 }
 0x1e6   :  { %2322 = vmatmul.mubr.msk.f32.gmra.mrb[42].mxu0 %vm600_vm1, %v1069_v38  ;;  %v1071_v45 = vmax.f32 %v917_v19, 0.0 }
 0x1e7   :  { %v1070_v42 = vmax.f32 %v912_v41, 0.0  ;;  %v2241_v43 = vpop.f32.mrb[46].mxu1 }
 0x1e8   :  { %v927_v46 = vadd.f32 %v2241_v43, %v2878_v39  ;;  %v921_v47 = vpop.f32.mrb[47].mxu1 }
 0x1e9   :  { %v922_v48 = vadd.f32 %v2878_v39, %v921_v47  ;;  %2324 = vmatprep.mubr.msk.f32.mxu0 %vm600_vm1, %v1070_v42 }
 0x1ea   :  { %2325 = vmatmul.mubr.msk.f32.gmra.mrb[44].mxu0 %vm600_vm1, %v1071_v45  ;;  %v1073_v51 = vmax.f32 %v927_v46, 0.0 }
 0x1eb   :  { %v1072_v49 = vmax.f32 %v922_v48, 0.0  ;;  %v2244_v50 = vpop.f32.mrb[48].mxu1 }
 0x1ec   :  { %v937_v54 = vadd.f32 %v2244_v50, %v2878_v39  ;;  %v931_v55 = vpop.f32.mrb[49].mxu1 }
 0x1ed   :  { %v932_v56 = vadd.f32 %v2878_v39, %v931_v55  ;;  %2327 = vmatprep.mubr.msk.f32.mxu0 %vm600_vm1, %v1072_v49 }
 0x1ee   :  { %2328 = vmatmul.mubr.msk.f32.gmra.mrb[46].mxu0 %vm600_vm1, %v1073_v51  ;;  %v1075_v59 = vmax.f32 %v937_v54, 0.0 }
 0x1ef   :  { %v1074_v57 = vmax.f32 %v932_v56, 0.0  ;;  %v2247_v58 = vpop.f32.mrb[50].mxu1 }
 0x1f0   :  { %v947_v60 = vadd.f32 %v2247_v58, %v2878_v39  ;;  %v941_v62 = vpop.f32.mrb[51].mxu1 }
 0x1f1   :  { %v942_v63 = vadd.f32 %v2878_v39, %v941_v62  ;;  %2330 = vmatprep.mubr.msk.f32.mxu0 %vm600_vm1, %v1074_v57 }
 0x1f2   :  { %2331 = vmatmul.mubr.msk.f32.gmra.mrb[48].mxu0 %vm600_vm1, %v1075_v59  ;;  %v1077_v3 = vmax.f32 %v947_v60, 0.0 }
 0x1f3   :  { %v1076_v1 = vmax.f32 %v942_v63, 0.0  ;;  %v2250_v2 = vpop.f32.mrb[52].mxu1  ;;  %v2976_v63 = vld [vmem:[#allocation2] ss:$0 sm:$0xff] }
 0x1f4   :  { %v957_v4 = vadd.f32 %v2250_v2, %v2878_v39  ;;  %v951_v5 = vpop.f32.mrb[53].mxu1 }
 0x1f5   :  { %v952_v6 = vadd.f32 %v2878_v39, %v951_v5  ;;  %2333 = vmatprep.mubr.msk.f32.mxu0 %vm600_vm1, %v1076_v1 }
 0x1f6   :  { %2334 = vmatmul.mubr.msk.f32.gmra.mrb[50].mxu0 %vm600_vm1, %v1077_v3  ;;  %v1079_v11 = vmax.f32 %v957_v4, 0.0 }
 0x1f7   :  { %v1078_v8 = vmax.f32 %v952_v6, 0.0  ;;  %v2253_v9 = vpop.f32.mrb[54].mxu1 }
 0x1f8   :  { %v967_v12 = vadd.f32 %v2253_v9, %v2878_v39  ;;  %v961_v13 = vpop.f32.mrb[55].mxu1 }
 0x1f9   :  { %v962_v14 = vadd.f32 %v2878_v39, %v961_v13  ;;  %2336 = vmatprep.mubr.msk.f32.mxu0 %vm600_vm1, %v1078_v8 }
 0x1fa   :  { %2337 = vmatmul.mubr.msk.f32.gmra.mrb[52].mxu0 %vm600_vm1, %v1079_v11  ;;  %v1081_v18 = vmax.f32 %v967_v12, 0.0 }
 0x1fb   :  { %v1080_v20 = vmax.f32 %v962_v14, 0.0  ;;  %v2256_v16 = vpop.f32.mrb[56].mxu1 }
 0x1fc   :  { %v977_v21 = vadd.f32 %v2256_v16, %v2878_v39  ;;  %v971_v22 = vpop.f32.mrb[57].mxu1 }
 0x1fd   :  { %v972_v25 = vadd.f32 %v2878_v39, %v971_v22  ;;  %2339 = vmatprep.mubr.msk.f32.mxu0 %vm600_vm1, %v1080_v20 }
 0x1fe   :  { %2340 = vmatmul.mubr.msk.f32.gmra.mrb[54].mxu0 %vm600_vm1, %v1081_v18  ;;  %v1083_v17 = vmax.f32 %v977_v21, 0.0 }
 0x1ff   :  { %v1082_v26 = vmax.f32 %v972_v25, 0.0  ;;  %v2259_v28 = vpop.f32.mrb[58].mxu1 }
 0x200   :  { %v987_v27 = vadd.f32 %v2259_v28, %v2878_v39  ;;  %v981_v29 = vpop.f32.mrb[59].mxu1 }
 0x201   :  { %v982_v30 = vadd.f32 %v2878_v39, %v981_v29  ;;  %2342 = vmatprep.mubr.msk.f32.mxu0 %vm600_vm1, %v1082_v26 }
 0x202   :  { %2343 = vmatmul.mubr.msk.f32.gmra.mrb[56].mxu0 %vm600_vm1, %v1083_v17  ;;  %v1085_v31 = vmax.f32 %v987_v27, 0.0 }
 0x203   :  { %v1084_v24 = vmax.f32 %v982_v30, 0.0  ;;  %v2262_v36 = vpop.f32.mrb[60].mxu1 }
 0x204   :  { %v997_v34 = vadd.f32 %v2262_v36, %v2878_v39  ;;  %v991_v44 = vpop.f32.mrb[61].mxu1 }
 0x205   :  { %v992_v32 = vadd.f32 %v2878_v39, %v991_v44  ;;  %2345 = vmatprep.mubr.msk.f32.mxu0 %vm600_vm1, %v1084_v24 }
 0x206   :  { %2346 = vmatmul.mubr.msk.f32.gmra.mrb[58].mxu0 %vm600_vm1, %v1085_v31  ;;  %v1087_v15 = vmax.f32 %v997_v34, 0.0 }
 0x207   :  { %v1086_v35 = vmax.f32 %v992_v32, 0.0  ;;  %v2265_v53 = vpop.f32.mrb[62].mxu1 }
 0x208   :  { %v1007_v40 = vadd.f32 %v2265_v53, %v2878_v39  ;;  %v1001_v0 = vpop.f32.mrb[63].mxu1 }
 0x209   :  { %v1002_v52 = vadd.f32 %v2878_v39, %v1001_v0  ;;  %2348 = vmatprep.mubr.msk.f32.mxu0 %vm600_vm1, %v1086_v35 }
 0x20a   :  { %2349 = vmatmul.mubr.msk.f32.gmra.mrb[60].mxu0 %vm600_vm1, %v1087_v15  ;;  %v1089_v23 = vmax.f32 %v1007_v40, 0.0 }
 0x20b   :  { %v1088_v10 = vmax.f32 %v1002_v52, 0.0  ;;  %v2268_v61 = vpop.f32.mrb[64].mxu1 }
 0x20c   :  { %v1017_v7 = vadd.f32 %v2268_v61, %v2878_v39  ;;  %v1011_v37 = vpop.f32.mrb[65].mxu1 }
 0x20d   :  { %v1012_v38 = vadd.f32 %v2878_v39, %v1011_v37  ;;  %2351 = vmatprep.mubr.msk.f32.mxu0 %vm600_vm1, %v1088_v10 }
 0x20e   :  { %2352 = vmatmul.mubr.msk.f32.gmra.mrb[62].mxu0 %vm600_vm1, %v1089_v23  ;;  %v1091_v41 = vmax.f32 %v1017_v7, 0.0 }
 0x20f   :  { %v1090_v19 = vmax.f32 %v1012_v38, 0.0  ;;  %v2271_v33 = vpop.f32.mrb[66].mxu1 }
 0x210   :  { %v1027_v42 = vadd.f32 %v2271_v33, %v2878_v39  ;;  %v1021_v43 = vpop.f32.mrb[67].mxu1 }
 0x211   :  { %v1022_v45 = vadd.f32 %v2878_v39, %v1021_v43  ;;  %2354 = vmatprep.mubr.msk.f32.mxu0 %vm600_vm1, %v1090_v19 }
 0x212   :  { %2355 = vmatmul.mubr.msk.f32.gmra.mrb[64].mxu0 %vm600_vm1, %v1091_v41  ;;  %v1093_v48 = vmax.f32 %v1027_v42, 0.0 }
 0x213   :  { %v1092_v46 = vmax.f32 %v1022_v45, 0.0  ;;  %v2274_v47 = vpop.f32.mrb[68].mxu1 }
 0x214   :  { %v1037_v49 = vadd.f32 %v2274_v47, %v2878_v39  ;;  %v1031_v50 = vpop.f32.mrb[69].mxu1 }
 0x215   :  { %v1032_v51 = vadd.f32 %v2878_v39, %v1031_v50  ;;  %2357 = vmatprep.mubr.msk.f32.mxu0 %vm600_vm1, %v1092_v46 }
 0x216   :  { %2358 = vmatmul.mubr.msk.f32.gmra.mrb[66].mxu0 %vm600_vm1, %v1093_v48  ;;  %v1095_v56 = vmax.f32 %v1037_v49, 0.0 }
 0x217   :  { %v1094_v54 = vmax.f32 %v1032_v51, 0.0  ;;  %v2277_v55 = vpop.f32.mrb[70].mxu1 }
 0x218   :  { %v1047_v57 = vadd.f32 %v2277_v55, %v2878_v39  ;;  %v1041_v58 = vpop.f32.mrb[71].mxu1 }
 0x219   :  { %v1042_v59 = vadd.f32 %v2878_v39, %v1041_v58  ;;  %2360 = vmatprep.mubr.msk.f32.mxu0 %vm600_vm1, %v1094_v54 }
 0x21a   :  { %2361 = vmatmul.mubr.msk.f32.gmra.mrb[68].mxu0 %vm600_vm1, %v1095_v56  ;;  %v1097_v62 = vmax.f32 %v1047_v57, 0.0 }
 0x21b   :  { %v1096_v60 = vmax.f32 %v1042_v59, 0.0 }
 0x21d   :  { %2363 = vmatprep.mubr.msk.f32.mxu0 %vm600_vm1, %v1096_v60 }
 0x21e   :  { %2364 = vmatmul.mubr.msk.f32.gmra.mrb[70].mxu0 %vm600_vm1, %v1097_v62 }
 0x295   :  { %v2296_v1 = vpop.f32.mrb[24].mxu0 }
 0x296   :  { %v1329_v2 = vadd.f32 %v2296_v1, %v2976_v63  ;;  %v1323_v3 = vpop.f32.mrb[25].mxu0 }
 0x297   :  { %v1324_v4 = vadd.f32 %v2976_v63, %v1323_v3 }
 0x298   :  { %1564 = vst.msk [vmem:[#allocation3 + $0x8] sm:$0xff] %vm1562_vm2, %v1329_v2 }
 0x299   :  { %1563 = vst.msk [vmem:[#allocation3] sm:$0xff] %vm1562_vm2, %v1324_v4  ;;  %v2299_v39 = vpop.f32.mrb[26].mxu0 }
 0x29a   :  { %v1339_v5 = vadd.f32 %v2299_v39, %v2976_v63  ;;  %v1333_v6 = vpop.f32.mrb[27].mxu0 }
 0x29b   :  { %v1334_v8 = vadd.f32 %v2976_v63, %v1333_v6 }
 0x29c   :  { %1566 = vst.msk [vmem:[#allocation3 + $0x18] sm:$0xff] %vm1562_vm2, %v1339_v5 }
 0x29d   :  { %1565 = vst.msk [vmem:[#allocation3 + $0x10] sm:$0xff] %vm1562_vm2, %v1334_v8  ;;  %v2302_v9 = vpop.f32.mrb[28].mxu0 }
 0x29e   :  { %v1349_v11 = vadd.f32 %v2302_v9, %v2976_v63  ;;  %v1343_v12 = vpop.f32.mrb[29].mxu0 }
 0x29f   :  { %v1716_v13 = vld [vmem:[#allocation3 + $0x8] sm:$0xff]  ;;  %v1344_v14 = vadd.f32 %v2976_v63, %v1343_v12 }
 0x2a0   :  { %1717 = vst [vmem:[%s3175_s7 + $0x8] sm:$0xff] %v1716_v13  ;;  %v1714_v20 = vld [vmem:[#allocation3] sm:$0xff]  ;;  %1568 = vst.msk [vmem:[#allocation3 + $0x28] sm:$0xff] %vm1562_vm2, %v1349_v11 }
 0x2a1   :  { %1715 = vst [vmem:[%s3175_s7] sm:$0xff] %v1714_v20  ;;  %1567 = vst.msk [vmem:[#allocation3 + $0x20] sm:$0xff] %vm1562_vm2, %v1344_v14  ;;  %v2305_v16 = vpop.f32.mrb[30].mxu0 }
 0x2a2   :  { %v1359_v18 = vadd.f32 %v2305_v16, %v2976_v63  ;;  %v1353_v21 = vpop.f32.mrb[31].mxu0 }
 0x2a3   :  { %v1720_v22 = vld [vmem:[#allocation3 + $0x18] sm:$0xff]  ;;  %v1354_v25 = vadd.f32 %v2976_v63, %v1353_v21 }
 0x2a4   :  { %1721 = vst [vmem:[%s3175_s7 + $0x18] sm:$0xff] %v1720_v22  ;;  %v1718_v26 = vld [vmem:[#allocation3 + $0x10] sm:$0xff]  ;;  %1570 = vst.msk [vmem:[#allocation3 + $0x38] sm:$0xff] %vm1562_vm2, %v1359_v18 }
 0x2a5   :  { %1719 = vst [vmem:[%s3175_s7 + $0x10] sm:$0xff] %v1718_v26  ;;  %1569 = vst.msk [vmem:[#allocation3 + $0x30] sm:$0xff] %vm1562_vm2, %v1354_v25  ;;  %v2308_v28 = vpop.f32.mrb[32].mxu0 }
 0x2a6   :  { %v1369_v17 = vadd.f32 %v2308_v28, %v2976_v63  ;;  %v1363_v27 = vpop.f32.mrb[33].mxu0 }
 0x2a7   :  { %v1724_v29 = vld [vmem:[#allocation3 + $0x28] sm:$0xff]  ;;  %v1364_v30 = vadd.f32 %v2976_v63, %v1363_v27 }
 0x2a8   :  { %1725 = vst [vmem:[%s3175_s7 + $0x28] sm:$0xff] %v1724_v29  ;;  %v1722_v24 = vld [vmem:[#allocation3 + $0x20] sm:$0xff]  ;;  %1572 = vst.msk [vmem:[#allocation3 + $0x48] sm:$0xff] %vm1562_vm2, %v1369_v17 }
 0x2a9   :  { %1723 = vst [vmem:[%s3175_s7 + $0x20] sm:$0xff] %v1722_v24  ;;  %1571 = vst.msk [vmem:[#allocation3 + $0x40] sm:$0xff] %vm1562_vm2, %v1364_v30  ;;  %v2311_v36 = vpop.f32.mrb[34].mxu0 }
 0x2aa   :  { %v1379_v31 = vadd.f32 %v2311_v36, %v2976_v63  ;;  %v1373_v34 = vpop.f32.mrb[35].mxu0 }
 0x2ab   :  { %v1728_v44 = vld [vmem:[#allocation3 + $0x38] sm:$0xff]  ;;  %v1374_v32 = vadd.f32 %v2976_v63, %v1373_v34 }
 0x2ac   :  { %1729 = vst [vmem:[%s3175_s7 + $0x38] sm:$0xff] %v1728_v44  ;;  %v1726_v35 = vld [vmem:[#allocation3 + $0x30] sm:$0xff]  ;;  %1574 = vst.msk [vmem:[#allocation3 + $0x58] sm:$0xff] %vm1562_vm2, %v1379_v31 }
 0x2ad   :  { %1727 = vst [vmem:[%s3175_s7 + $0x30] sm:$0xff] %v1726_v35  ;;  %1573 = vst.msk [vmem:[#allocation3 + $0x50] sm:$0xff] %vm1562_vm2, %v1374_v32  ;;  %v2314_v53 = vpop.f32.mrb[36].mxu0 }
 0x2ae   :  { %v1389_v15 = vadd.f32 %v2314_v53, %v2976_v63  ;;  %v1383_v40 = vpop.f32.mrb[37].mxu0 }
 0x2af   :  { %v1732_v0 = vld [vmem:[#allocation3 + $0x48] sm:$0xff]  ;;  %v1384_v52 = vadd.f32 %v2976_v63, %v1383_v40 }
 0x2b0   :  { %1733 = vst [vmem:[%s3175_s7 + $0x48] sm:$0xff] %v1732_v0  ;;  %v1730_v10 = vld [vmem:[#allocation3 + $0x40] sm:$0xff]  ;;  %1576 = vst.msk [vmem:[#allocation3 + $0x68] sm:$0xff] %vm1562_vm2, %v1389_v15 }
 0x2b1   :  { %1731 = vst [vmem:[%s3175_s7 + $0x40] sm:$0xff] %v1730_v10  ;;  %1575 = vst.msk [vmem:[#allocation3 + $0x60] sm:$0xff] %vm1562_vm2, %v1384_v52  ;;  %v2317_v61 = vpop.f32.mrb[38].mxu0 }
 0x2b2   :  { %v1399_v23 = vadd.f32 %v2317_v61, %v2976_v63  ;;  %v1393_v7 = vpop.f32.mrb[39].mxu0 }
 0x2b3   :  { %v1736_v37 = vld [vmem:[#allocation3 + $0x58] sm:$0xff]  ;;  %v1394_v38 = vadd.f32 %v2976_v63, %v1393_v7 }
 0x2b4   :  { %1737 = vst [vmem:[%s3175_s7 + $0x58] sm:$0xff] %v1736_v37  ;;  %v1734_v19 = vld [vmem:[#allocation3 + $0x50] sm:$0xff]  ;;  %1578 = vst.msk [vmem:[#allocation3 + $0x78] sm:$0xff] %vm1562_vm2, %v1399_v23 }
 0x2b5   :  { %1735 = vst [vmem:[%s3175_s7 + $0x50] sm:$0xff] %v1734_v19  ;;  %1577 = vst.msk [vmem:[#allocation3 + $0x70] sm:$0xff] %vm1562_vm2, %v1394_v38  ;;  %v2320_v33 = vpop.f32.mrb[40].mxu0 }
 0x2b6   :  { %v1409_v41 = vadd.f32 %v2320_v33, %v2976_v63  ;;  %v1403_v42 = vpop.f32.mrb[41].mxu0 }
 0x2b7   :  { %v1740_v43 = vld [vmem:[#allocation3 + $0x68] sm:$0xff]  ;;  %v1404_v45 = vadd.f32 %v2976_v63, %v1403_v42 }
 0x2b8   :  { %1741 = vst [vmem:[%s3175_s7 + $0x68] sm:$0xff] %v1740_v43  ;;  %v1738_v46 = vld [vmem:[#allocation3 + $0x60] sm:$0xff]  ;;  %1580 = vst.msk [vmem:[#allocation3 + $0x88] sm:$0xff] %vm1562_vm2, %v1409_v41 }
 0x2b9   :  { %1739 = vst [vmem:[%s3175_s7 + $0x60] sm:$0xff] %v1738_v46  ;;  %1579 = vst.msk [vmem:[#allocation3 + $0x80] sm:$0xff] %vm1562_vm2, %v1404_v45  ;;  %v2323_v47 = vpop.f32.mrb[42].mxu0 }
 0x2ba   :  { %v1419_v48 = vadd.f32 %v2323_v47, %v2976_v63  ;;  %v1413_v49 = vpop.f32.mrb[43].mxu0 }
 0x2bb   :  { %v1744_v50 = vld [vmem:[#allocation3 + $0x78] sm:$0xff]  ;;  %v1414_v51 = vadd.f32 %v2976_v63, %v1413_v49 }
 0x2bc   :  { %1745 = vst [vmem:[%s3175_s7 + $0x78] sm:$0xff] %v1744_v50  ;;  %v1742_v54 = vld [vmem:[#allocation3 + $0x70] sm:$0xff]  ;;  %1582 = vst.msk [vmem:[#allocation3 + $0x98] sm:$0xff] %vm1562_vm2, %v1419_v48 }
 0x2bd   :  { %1743 = vst [vmem:[%s3175_s7 + $0x70] sm:$0xff] %v1742_v54  ;;  %1581 = vst.msk [vmem:[#allocation3 + $0x90] sm:$0xff] %vm1562_vm2, %v1414_v51  ;;  %v2326_v55 = vpop.f32.mrb[44].mxu0 }
 0x2be   :  { %v1429_v56 = vadd.f32 %v2326_v55, %v2976_v63  ;;  %v1423_v57 = vpop.f32.mrb[45].mxu0 }
 0x2bf   :  { %v1748_v58 = vld [vmem:[#allocation3 + $0x88] sm:$0xff]  ;;  %v1424_v59 = vadd.f32 %v2976_v63, %v1423_v57 }
 0x2c0   :  { %1749 = vst [vmem:[%s3175_s7 + $0x88] sm:$0xff] %v1748_v58  ;;  %v1746_v60 = vld [vmem:[#allocation3 + $0x80] sm:$0xff]  ;;  %1584 = vst.msk [vmem:[#allocation3 + $0xa8] sm:$0xff] %vm1562_vm2, %v1429_v56 }
 0x2c1   :  { %1747 = vst [vmem:[%s3175_s7 + $0x80] sm:$0xff] %v1746_v60  ;;  %1583 = vst.msk [vmem:[#allocation3 + $0xa0] sm:$0xff] %vm1562_vm2, %v1424_v59  ;;  %v2329_v62 = vpop.f32.mrb[46].mxu0 }
 0x2c2   :  { %v1439_v1 = vadd.f32 %v2329_v62, %v2976_v63  ;;  %v1433_v2 = vpop.f32.mrb[47].mxu0 }
 0x2c3   :  { %v1752_v3 = vld [vmem:[#allocation3 + $0x98] sm:$0xff]  ;;  %v1434_v4 = vadd.f32 %v2976_v63, %v1433_v2 }
 0x2c4   :  { %1753 = vst [vmem:[%s3175_s7 + $0x98] sm:$0xff] %v1752_v3  ;;  %v1750_v39 = vld [vmem:[#allocation3 + $0x90] sm:$0xff]  ;;  %1586 = vst.msk [vmem:[#allocation3 + $0xb8] sm:$0xff] %vm1562_vm2, %v1439_v1 }
 0x2c5   :  { %1751 = vst [vmem:[%s3175_s7 + $0x90] sm:$0xff] %v1750_v39  ;;  %1585 = vst.msk [vmem:[#allocation3 + $0xb0] sm:$0xff] %vm1562_vm2, %v1434_v4  ;;  %v2332_v5 = vpop.f32.mrb[48].mxu0 }
 0x2c6   :  { %v1449_v6 = vadd.f32 %v2332_v5, %v2976_v63  ;;  %v1443_v8 = vpop.f32.mrb[49].mxu0 }
 0x2c7   :  { %v1756_v9 = vld [vmem:[#allocation3 + $0xa8] sm:$0xff]  ;;  %v1444_v11 = vadd.f32 %v2976_v63, %v1443_v8 }
 0x2c8   :  { %1757 = vst [vmem:[%s3175_s7 + $0xa8] sm:$0xff] %v1756_v9  ;;  %v1754_v12 = vld [vmem:[#allocation3 + $0xa0] sm:$0xff]  ;;  %1588 = vst.msk [vmem:[#allocation3 + $0xc8] sm:$0xff] %vm1562_vm2, %v1449_v6 }
 0x2c9   :  { %1755 = vst [vmem:[%s3175_s7 + $0xa0] sm:$0xff] %v1754_v12  ;;  %1587 = vst.msk [vmem:[#allocation3 + $0xc0] sm:$0xff] %vm1562_vm2, %v1444_v11  ;;  %v2335_v13 = vpop.f32.mrb[50].mxu0 }
 0x2ca   :  { %v1459_v14 = vadd.f32 %v2335_v13, %v2976_v63  ;;  %v1453_v20 = vpop.f32.mrb[51].mxu0 }
 0x2cb   :  { %v1760_v16 = vld [vmem:[#allocation3 + $0xb8] sm:$0xff]  ;;  %v1454_v18 = vadd.f32 %v2976_v63, %v1453_v20 }
 0x2cc   :  { %1761 = vst [vmem:[%s3175_s7 + $0xb8] sm:$0xff] %v1760_v16  ;;  %v1758_v21 = vld [vmem:[#allocation3 + $0xb0] sm:$0xff]  ;;  %1590 = vst.msk [vmem:[#allocation3 + $0xd8] sm:$0xff] %vm1562_vm2, %v1459_v14 }
 0x2cd   :  { %1759 = vst [vmem:[%s3175_s7 + $0xb0] sm:$0xff] %v1758_v21  ;;  %1589 = vst.msk [vmem:[#allocation3 + $0xd0] sm:$0xff] %vm1562_vm2, %v1454_v18  ;;  %v2338_v22 = vpop.f32.mrb[52].mxu0 }
 0x2ce   :  { %v1469_v25 = vadd.f32 %v2338_v22, %v2976_v63  ;;  %v1463_v26 = vpop.f32.mrb[53].mxu0 }
 0x2cf   :  { %v1764_v28 = vld [vmem:[#allocation3 + $0xc8] sm:$0xff]  ;;  %v1464_v17 = vadd.f32 %v2976_v63, %v1463_v26 }
 0x2d0   :  { %1765 = vst [vmem:[%s3175_s7 + $0xc8] sm:$0xff] %v1764_v28  ;;  %v1762_v27 = vld [vmem:[#allocation3 + $0xc0] sm:$0xff]  ;;  %1592 = vst.msk [vmem:[#allocation3 + $0xe8] sm:$0xff] %vm1562_vm2, %v1469_v25 }
 0x2d1   :  { %1763 = vst [vmem:[%s3175_s7 + $0xc0] sm:$0xff] %v1762_v27  ;;  %1591 = vst.msk [vmem:[#allocation3 + $0xe0] sm:$0xff] %vm1562_vm2, %v1464_v17  ;;  %v2341_v29 = vpop.f32.mrb[54].mxu0 }
 0x2d2   :  { %v1479_v30 = vadd.f32 %v2341_v29, %v2976_v63  ;;  %v1473_v24 = vpop.f32.mrb[55].mxu0 }
 0x2d3   :  { %v1768_v36 = vld [vmem:[#allocation3 + $0xd8] sm:$0xff]  ;;  %v1474_v31 = vadd.f32 %v2976_v63, %v1473_v24 }
 0x2d4   :  { %1769 = vst [vmem:[%s3175_s7 + $0xd8] sm:$0xff] %v1768_v36  ;;  %v1766_v34 = vld [vmem:[#allocation3 + $0xd0] sm:$0xff]  ;;  %1594 = vst.msk [vmem:[#allocation3 + $0xf8] sm:$0xff] %vm1562_vm2, %v1479_v30 }
 0x2d5   :  { %1767 = vst [vmem:[%s3175_s7 + $0xd0] sm:$0xff] %v1766_v34  ;;  %1593 = vst.msk [vmem:[#allocation3 + $0xf0] sm:$0xff] %vm1562_vm2, %v1474_v31  ;;  %v2344_v44 = vpop.f32.mrb[56].mxu0 }
 0x2d6   :  { %v1489_v32 = vadd.f32 %v2344_v44, %v2976_v63  ;;  %v1483_v35 = vpop.f32.mrb[57].mxu0 }
 0x2d7   :  { %v1772_v53 = vld [vmem:[#allocation3 + $0xe8] sm:$0xff]  ;;  %v1484_v15 = vadd.f32 %v2976_v63, %v1483_v35 }
 0x2d8   :  { %1773 = vst [vmem:[%s3175_s7 + $0xe8] sm:$0xff] %v1772_v53  ;;  %v1770_v40 = vld [vmem:[#allocation3 + $0xe0] sm:$0xff]  ;;  %1596 = vst.msk [vmem:[#allocation3 + $0x108] sm:$0xff] %vm1562_vm2, %v1489_v32 }
 0x2d9   :  { %1771 = vst [vmem:[%s3175_s7 + $0xe0] sm:$0xff] %v1770_v40  ;;  %1595 = vst.msk [vmem:[#allocation3 + $0x100] sm:$0xff] %vm1562_vm2, %v1484_v15  ;;  %v2347_v0 = vpop.f32.mrb[58].mxu0 }
 0x2da   :  { %v1499_v52 = vadd.f32 %v2347_v0, %v2976_v63  ;;  %v1493_v10 = vpop.f32.mrb[59].mxu0 }
 0x2db   :  { %v1776_v61 = vld [vmem:[#allocation3 + $0xf8] sm:$0xff]  ;;  %v1494_v23 = vadd.f32 %v2976_v63, %v1493_v10 }
 0x2dc   :  { %1777 = vst [vmem:[%s3175_s7 + $0xf8] sm:$0xff] %v1776_v61  ;;  %v1774_v7 = vld [vmem:[#allocation3 + $0xf0] sm:$0xff]  ;;  %1598 = vst.msk [vmem:[#allocation3 + $0x118] sm:$0xff] %vm1562_vm2, %v1499_v52 }
 0x2dd   :  { %1775 = vst [vmem:[%s3175_s7 + $0xf0] sm:$0xff] %v1774_v7  ;;  %1597 = vst.msk [vmem:[#allocation3 + $0x110] sm:$0xff] %vm1562_vm2, %v1494_v23  ;;  %v2350_v37 = vpop.f32.mrb[60].mxu0 }
 0x2de   :  { %v1509_v38 = vadd.f32 %v2350_v37, %v2976_v63  ;;  %v1503_v19 = vpop.f32.mrb[61].mxu0 }
 0x2df   :  { %v1780_v33 = vld [vmem:[#allocation3 + $0x108] sm:$0xff]  ;;  %v1504_v41 = vadd.f32 %v2976_v63, %v1503_v19 }
 0x2e0   :  { %1781 = vst [vmem:[%s3175_s7 + $0x108] sm:$0xff] %v1780_v33  ;;  %v1778_v42 = vld [vmem:[#allocation3 + $0x100] sm:$0xff]  ;;  %1600 = vst.msk [vmem:[#allocation3 + $0x128] sm:$0xff] %vm1562_vm2, %v1509_v38 }
 0x2e1   :  { %1779 = vst [vmem:[%s3175_s7 + $0x100] sm:$0xff] %v1778_v42  ;;  %1599 = vst.msk [vmem:[#allocation3 + $0x120] sm:$0xff] %vm1562_vm2, %v1504_v41  ;;  %v2353_v43 = vpop.f32.mrb[62].mxu0 }
 0x2e2   :  { %v1513_v45 = vpop.f32.mrb[63].mxu0 }
 0x2e3   :  { %v1784_v46 = vld [vmem:[#allocation3 + $0x118] sm:$0xff] }
 0x2e4   :  { %1785 = vst [vmem:[%s3175_s7 + $0x118] sm:$0xff] %v1784_v46  ;;  %v1782_v63 = vld [vmem:[#allocation3 + $0x110] sm:$0xff] }
 0x2e5   :  { %1783 = vst [vmem:[%s3175_s7 + $0x110] sm:$0xff] %v1782_v63  ;;  %v2356_v47 = vpop.f32.mrb[64].mxu0 }
 0x2e6   :  { %v1523_v48 = vpop.f32.mrb[65].mxu0 }
 0x2e7   :  { %v1788_v49 = vld [vmem:[#allocation3 + $0x128] sm:$0xff] }
 0x2e8   :  { %1789 = vst [vmem:[%s3175_s7 + $0x128] sm:$0xff] %v1788_v49  ;;  %v1786_v50 = vld [vmem:[#allocation3 + $0x120] sm:$0xff] }
 0x2e9   :  { %1787 = vst [vmem:[%s3175_s7 + $0x120] sm:$0xff] %v1786_v50  ;;  %v2359_v51 = vpop.f32.mrb[66].mxu0 }
 0x2ea   :  { %v1533_v54 = vpop.f32.mrb[67].mxu0 }
 0x2ed   :  { %v2362_v55 = vpop.f32.mrb[68].mxu0 }
 0x2ee   :  { %v1543_v56 = vpop.f32.mrb[69].mxu0 }
 0x2f1   :  { %v2365_v57 = vpop.f32.mrb[70].mxu0 }
 0x2f2   :  { %v1553_v58 = vpop.f32.mrb[71].mxu0 }

</bundles_post_ra>
